<compile_context>
chip_gen: v5e
topology: v5e:2x2
jax: 0.10.0
libtpu: 0.0.40
codegen_flags: <defaults>
</compile_context>

<pallas_src>
import math

import jax
import jax.numpy as jnp
from jax.experimental import pallas as pl
from jax.experimental.pallas import tpu as pltpu


def _layer_scale_kernel(x_ref, gamma_ref, o_ref):
    # (tm, tl) * (1, tl) -> (tm, tl): pure VPU elementwise, gamma resident in VMEM.
    o_ref[...] = x_ref[...] * gamma_ref[...]


def _round_up(a: int, b: int) -> int:
    return ((a + b - 1) // b) * b


def _tensorcores_per_chip() -> int:
    """2 TensorCores/chip on v7x; 1 on v5e/v6e. Conservative default is 1."""
    try:
        kind = jax.devices()[0].device_kind.lower()
    except Exception:
        return 1
    return 2 if "7" in kind else 1


_TARGET_TILE_BYTES = 4 * 1024 * 1024   # ~4 MiB x tile: near HBM roofline on v5e/v6e/v7x
_VMEM_LIMIT_BYTES = 48 * 1024 * 1024   # < v7x 64 MiB physical; generous for v5e/v6e


def _pick_lane_fold(M: int, D: int) -> int:
    """Rows-into-lanes fold factor k. Only fold when it's a free reshape (M % k == 0)."""
    if D % 128 == 0:
        if D < 512:
            k = -(-512 // D)            # widen to >= 512 lanes only if it's free
            if M % k == 0:
                return k
        return 1
    k0 = 128 // math.gcd(D, 128)        # minimal fold making lanes a multiple of 128
    k_pref = k0 * max(1, -(-512 // (k0 * D)))   # prefer >= 512 lanes
    if M % k_pref == 0:
        return k_pref
    if M % k0 == 0:
        return k0
    return 1   # copy-free fallback: unfolded, block lane dim == full D (masked stores)


def layer_scale(x: jax.Array, gamma: jax.Array) -> jax.Array:
    """y = x * gamma, gamma shape (dim,), broadcast over all leading dims of x."""
    orig_shape = x.shape
    D = orig_shape[-1]
    assert gamma.shape == (D,), f"gamma must be ({D},), got {gamma.shape}"

    if x.size == 0:                      # degenerate empty input: nothing to do
        return x

    x2 = x.reshape(-1, D)                # (M, D): metadata-only reshape
    M = x2.shape[0]

    itemsize = jnp.dtype(x.dtype).itemsize
    sublane_mult = 8 * max(1, 4 // itemsize)   # 8 rows f32, 16 bf16, 32 int8/fp8

    # --- Lane folding (free reshapes only; no padding, ever).
    k = _pick_lane_fold(M, D)
    Dl = k * D
    Mr = M // k
    x3 = x2.reshape(Mr, Dl)              # contiguous -> metadata-only

    # --- Lane tile: split very wide rows so a block never exceeds ~4 MiB.
    if sublane_mult * Dl * itemsize > _TARGET_TILE_BYTES:
        tl = max(128, (_TARGET_TILE_BYTES // (sublane_mult * itemsize)) // 128 * 128)
        tl = min(tl, _round_up(Dl, 128))
    else:
        tl = Dl

    # --- Row tile: ~4 MiB per x tile, aligned to the dtype's sublane packing.
    tm = max(sublane_mult,
             (_TARGET_TILE_BYTES // max(tl * itemsize, 1)) // sublane_mult * sublane_mult)
    tm = min(tm, _round_up(Mr, sublane_mult))

    grid_cols = pl.cdiv(Dl, tl)
    grid_rows = pl.cdiv(Mr, tm)

    # --- v7x only (2 TensorCores): keep the row grid >= 2 and even so both cores
    # get balanced work. Single-TC v5e/v6e skip this (pure per-step overhead).
    if _tensorcores_per_chip() > 1 and grid_cols == 1 and Mr > sublane_mult:
        if grid_rows < 2:
            tm = max(sublane_mult, _round_up(pl.cdiv(Mr, 2), sublane_mult))
        elif grid_rows % 2 == 1 and grid_rows <= 8:
            tm = max(sublane_mult, _round_up(pl.cdiv(Mr, grid_rows + 1), sublane_mult))
        grid_rows = pl.cdiv(Mr, tm)

    gamma_lane = jnp.tile(gamma.astype(x.dtype), k).reshape(1, Dl)

    out = pl.pallas_call(
        _layer_scale_kernel,
        out_shape=jax.ShapeDtypeStruct((Mr, Dl), x.dtype),
        grid_spec=pltpu.PrefetchScalarGridSpec(
            num_scalar_prefetch=0,
            grid=(grid_rows, grid_cols),
            in_specs=[
                pl.BlockSpec((tm, tl), lambda i, j: (i, j)),
                pl.BlockSpec((1, tl), lambda i, j: (0, j)),   # gamma stays resident
            ],
            out_specs=pl.BlockSpec((tm, tl), lambda i, j: (i, j)),
        ),
        compiler_params=pltpu.CompilerParams(
            dimension_semantics=("parallel", "parallel"),
            vmem_limit_bytes=_VMEM_LIMIT_BYTES,
        ),
    )(x3, gamma_lane)

    return out.reshape(orig_shape)       # metadata-only reshape back (no slicing)


class LayerScale:
    """Mirror of the PyTorch module: gamma = init_values * ones(dim)."""

    def __init__(self, dim: int, init_values: float = 1e-5, inplace: bool = False):
        # TODO(synk): inplace=True (x.mul_) has no JAX analog; always out-of-place.
        self.inplace = inplace
        self.gamma = init_values * jnp.ones((dim,), dtype=jnp.float32)

    def __call__(self, x: jax.Array) -> jax.Array:
        return layer_scale(x, self.gamma)


if __name__ == "__main__":
    key = jax.random.PRNGKey(0)
    B, N, D = 2, 8, 32   # (batch, seq, hidden): narrow-D -> lane-folded path
    x = jax.random.normal(key, (B, N, D), dtype=jnp.float32)

    module = LayerScale(dim=D, init_values=1e-5)
    y = jax.block_until_ready(module(x))
    y_ref = x * module.gamma
    assert y.shape == x.shape and y.dtype == x.dtype
    assert jnp.allclose(y, y_ref, atol=0, rtol=0)

    # D % 128 == 0 with ragged M: no fold, no pad, ragged last row tile masked by Pallas.
    D2 = 256
    x_b = jax.random.normal(jax.random.PRNGKey(1), (3, 5, D2), dtype=jnp.float32)
    mod2 = LayerScale(dim=D2, init_values=1e-5)
    y_b = jax.block_until_ready(mod2(x_b))
    assert jnp.allclose(y_b, x_b * mod2.gamma, atol=0, rtol=0)

    # D % 128 != 0 and M not divisible by the fold factor: copy-free unfolded fallback.
    D3 = 48
    x_c = jax.random.normal(jax.random.PRNGKey(2), (3, 7, D3), dtype=jnp.float32)
    mod3 = LayerScale(dim=D3, init_values=1e-5)
    y_c = jax.block_until_ready(mod3(x_c))
    assert jnp.allclose(y_c, x_c * mod3.gamma, atol=0, rtol=0)

    print("KERNEL_OK")
</pallas_src>

<mosaic_0001>
module attributes {stable_mosaic.version = 11 : i64} {
  func.func @_layer_scale_kernel(%arg0: i32, %arg1: i32, %arg2: memref<8x512xf32, #tpu.memory_space<vmem>>, %arg3: memref<1x512xf32, #tpu.memory_space<vmem>>, %arg4: memref<8x512xf32, #tpu.memory_space<vmem>>) attributes {dimension_semantics = [#tpu.dimension_semantics<parallel>, #tpu.dimension_semantics<parallel>], iteration_bounds = array<i64: 1, 1>, scalar_prefetch = 0 : i64, scratch_operands = 0 : i64, tpu.core_type = #tpu.core_type<tc>, window_params = [{transform_indices = @transform_0, window_bounds = array<i64: 8, 512>}, {transform_indices = @transform_1, window_bounds = array<i64: 1, 512>}, {transform_indices = @transform_2, window_bounds = array<i64: 8, 512>}]} {
    %c0 = arith.constant 0 : index
    %c0_0 = arith.constant 0 : index
    %0 = vector.load %arg2[%c0, %c0_0] : memref<8x512xf32, #tpu.memory_space<vmem>>, vector<8x512xf32>
    %c0_1 = arith.constant 0 : index
    %c0_2 = arith.constant 0 : index
    %1 = vector.load %arg3[%c0_1, %c0_2] : memref<1x512xf32, #tpu.memory_space<vmem>>, vector<1x512xf32>
    %2 = vector.broadcast %1 : vector<1x512xf32> to vector<8x512xf32>
    %3 = arith.mulf %0, %2 : vector<8x512xf32>
    %c0_3 = arith.constant 0 : index
    %c0_4 = arith.constant 0 : index
    %4 = vector.load %arg4[%c0_3, %c0_4] : memref<8x512xf32, #tpu.memory_space<vmem>>, vector<8x512xf32>
    tpu.vector_store %arg4[%c0_3, %c0_4], %3 {strides = array<i32>} : memref<8x512xf32, #tpu.memory_space<vmem>>, vector<8x512xf32>,
    return
  }
  func.func @transform_0(%arg0: i32, %arg1: i32) -> (i32, i32) {
    %c0_i32 = arith.constant 0 : i32
    return %arg0, %arg1 : i32, i32
  }
  func.func @transform_1(%arg0: i32, %arg1: i32) -> (i32, i32) {
    %c0_i32 = arith.constant 0 : i32
    %c0_i32_0 = arith.constant 0 : i32
    return %c0_i32, %arg1 : i32, i32
  }
  func.func @transform_2(%arg0: i32, %arg1: i32) -> (i32, i32) {
    %c0_i32 = arith.constant 0 : i32
    return %arg0, %arg1 : i32, i32
  }
}

</mosaic_0001>

<bundles_post_ra>
// kernel: tpu_custom_call.1
= control target key start
LH: loop header
LB: loop body
LE: loop exit
PB: predicated region body
PF: predicated region fallthrough
CT: control target
= control target key end

     0   :  { %7 = vsyncpa [#allocation3], 0  ;;  %s316_s0 = inlined_call_operand.hbm [shape: f32[1,512], index: 0, kind: input, shape index: {}]   ;;  %s317_s1 = inlined_call_operand.hbm [shape: f32[1,512], index: 1, kind: input, shape index: {}]   ;;  %s318_s2 = inlined_call_operand.hbm [shape: f32[1,512], index: 2, kind: output, shape index: {}]  }
   0x1   :  { %8 = vsyncpa [#allocation6], 0 }
   0x2   :  { %9 = vsyncpa [#allocation4], 0 }
   0x3   :  { %13 = vsyncadd [#allocation3], 448  ;;  %s14_s11 = sshll.u32 %s316_s0, 4  ;;  %s237_s12 = smov [#allocation2]   ;;  %s15_s11 = int_to_ptr.hbm [resolvable:$true] %s14_s11 }
   0x4   :  { %s16_s13 = sshll.u32 %s237_s12, 4  ;;  %s28_s16 = sshll.u32 %s317_s1, 4  ;;  %s17_s13 = int_to_ptr.vmem [resolvable:$true] %s16_s13  ;;  %s29_s16 = int_to_ptr.hbm [resolvable:$true] %s28_s16 }
   0x5   :  { %s238_s17 = smov 64   ;;  %s239_s18 = smov 4  }
   0x6   :  { %22 = dma.hbm_to_vmem [thread:$0]  %s15_s11, 64, %s17_s13, [#allocation3], %s238_s17, %s238_s17, %s239_s18  }
   0x7   :  { %s240_s19 = smov [#allocation5]  }
   0x8   :  { %s30_s20 = sshll.u32 %s240_s19, 4  ;;  %s31_s20 = int_to_ptr.vmem [resolvable:$true] %s30_s20 }
   0x9   :  { %33 = dma.hbm_to_vmem [thread:$0]  %s29_s16, 64, %s31_s20, [#allocation6]  }
   0xa   :  { %231 = dma.done.wait [#allocation3], 512  }
   0xb   :  { %232 = vsyncadd [#allocation3], 4294966784 }
   0xc   :  { %233 = dma.done.wait [#allocation6], 64  }
   0xd   :  { %234 = vsyncadd [#allocation6], 4294967232  ;;  %v122_v0 = vlaneseq  ;;  %vm59_vm0 = vcmask 1040384   ;;  %vm61_vm1 = vcmask 1042434   ;;  %vm65_vm3 = vcmask 1041409  }
   0xe   :  { %v50_v1 = vld [vmem:[#allocation5] sm:$0xf]  ;;  %vm67_vm5 = vcmask 1043459   ;;  %vm69_vm6 = vcmask 1042433   ;;  %vm73_vm7 = vcmask 1044484   ;;  %vm75_vm8 = vcmask 1043458  }
   0xf   :  { %vm266_vm4 = vcmp.lt.s32.totalorder %v122_v0, 512  ;;  %v52_v3 = vperm.slane %v50_v1, 0  ;;  %v53_v4 = vperm.slane %v50_v1, 1  ;;  %v54_v5 = vperm.slane %v50_v1, 2  ;;  %v42_v10 = vld [vmem:[#allocation2] sm:$0xf] }
  0x10   :  { %v55_v6 = vperm.slane %v50_v1, 3  ;;  %vm81_vm10 = vcmask 1044483   ;;  %vm85_vm11 = vcmask 1046534   ;;  %vm87_vm12 = vcmask 1045508   ;;  %v43_v16 = vld [vmem:[#allocation2 + $0x4] sm:$0xf] }
  0x11   :  { %v56_v7 = vrot.slane %v53_v4, 7  ;;  %v57_v8 = vrot.slane %v54_v5, 6  ;;  %vm91_vm13 = vcmask 1046528   ;;  %vm93_vm14 = vcmask 1046533   ;;  %v44_v22 = vld [vmem:[#allocation2 + $0x8] sm:$0xf] }
  0x12   :  { %v58_v9 = vrot.slane %v55_v6, 5  ;;  %vm98_vm15 = vcmask 1045504   ;;  %vm321_vm9 = vcmask 1041408   ;;  %vm322_vm2 = vcmask 1045509   ;;  %v45_v30 = vld [vmem:[#allocation2 + $0xc] sm:$0xf] }
  0x13   :  { %v60_v11 = vsel %vm59_vm0, %v52_v3, %v56_v7  ;;  %v66_v13 = vsel %vm65_vm3, %v52_v3, %v56_v7  ;;  %v72_v18 = vsel %vm61_vm1, %v52_v3, %v56_v7  ;;  %v78_v24 = vsel %vm67_vm5, %v52_v3, %v56_v7  ;;  %v46_v32 = vld [vmem:[#allocation2 + $0x10] sm:$0xf]  ;;  %v47_v39 = vld [vmem:[#allocation2 + $0x14] sm:$0xf]  ;;  %v48_v47 = vld [vmem:[#allocation2 + $0x18] sm:$0xf] }
  0x14   :  { %v62_v12 = vsel %vm61_vm1, %v57_v8, %v58_v9  ;;  %v68_v14 = vsel %vm67_vm5, %v57_v8, %v58_v9  ;;  %v74_v19 = vsel %vm73_vm7, %v57_v8, %v58_v9  ;;  %v80_v26 = vsel %vm322_vm2, %v57_v8, %v58_v9  ;;  %vm323_vm1 = vmmov %vm322_vm2  ;;  %v49_v52 = vld [vmem:[#allocation2 + $0x1c] sm:$0xf] }
  0x15   :  { %v64_v15 = vsel %vm321_vm9, %v60_v11, %v62_v12  ;;  %v70_v17 = vsel %vm69_vm6, %v66_v13, %v68_v14  ;;  %v76_v23 = vsel %vm75_vm8, %v72_v18, %v74_v19  ;;  %v84_v27 = vsel %vm73_vm7, %v52_v3, %v56_v7 }
  0x16   :  { %v114_v20 = vmul.f32 %v64_v15, %v42_v10  ;;  %v71_v21 = vrot.slane %v70_v17, 1  ;;  %v77_v25 = vrot.slane %v76_v23, 2  ;;  %v86_v28 = vsel %vm85_vm11, %v57_v8, %v58_v9 }
  0x17   :  { %v82_v31 = vsel %vm81_vm10, %v78_v24, %v80_v26  ;;  %v88_v33 = vsel %vm87_vm12, %v84_v27, %v86_v28  ;;  %v90_v34 = vsel %vm323_vm1, %v52_v3, %v56_v7  ;;  %v92_v38 = vsel %vm91_vm13, %v58_v9, %v57_v8 }
  0x18   :  { %126 = vst.msk [vmem:[#allocation7] sm:$0xf] %vm266_vm4, %v114_v20  ;;  %v115_v29 = vmul.f32 %v71_v21, %v43_v16  ;;  %v116_v35 = vmul.f32 %v77_v25, %v44_v22  ;;  %v83_v36 = vrot.slane %v82_v31, 3  ;;  %v89_v37 = vrot.slane %v88_v33, 4 }
  0x19   :  { %v94_v40 = vsel %vm93_vm14, %v90_v34, %v92_v38  ;;  %v96_v41 = vsel %vm85_vm11, %v52_v3, %v56_v7  ;;  %v97_v42 = vsel %vm59_vm0, %v57_v8, %v58_v9  ;;  %v101_v43 = vsel %vm91_vm13, %v56_v7, %v52_v3 }
  0x1a   :  { %127 = vst.msk [vmem:[#allocation7 + $0x4] sm:$0xf] %vm266_vm4, %v115_v29  ;;  %v117_v44 = vmul.f32 %v83_v36, %v45_v30  ;;  %v118_v45 = vmul.f32 %v89_v37, %v46_v32  ;;  %v95_v46 = vrot.slane %v94_v40, 5  ;;  %v99_v48 = vsel %vm98_vm15, %v97_v42, %v96_v41 }
  0x1b   :  { %128 = vst.msk [vmem:[#allocation7 + $0x8] sm:$0xf] %vm266_vm4, %v116_v35  ;;  %v100_v49 = vrot.slane %v99_v48, 6  ;;  %v102_v50 = vsel %vm65_vm3, %v57_v8, %v58_v9  ;;  %vm324_vm0 = vcmask 1046529  }
  0x1c   :  { %129 = vst.msk [vmem:[#allocation7 + $0xc] sm:$0xf] %vm266_vm4, %v117_v44  ;;  %v119_v51 = vmul.f32 %v95_v46, %v47_v39  ;;  %v104_v53 = vsel %vm324_vm0, %v102_v50, %v101_v43 }
  0x1d   :  { %130 = vst.msk [vmem:[#allocation7 + $0x10] sm:$0xf] %vm266_vm4, %v118_v45  ;;  %v120_v54 = vmul.f32 %v100_v49, %v48_v47  ;;  %v105_v55 = vrot.slane %v104_v53, 7 }
  0x1e   :  { %131 = vst.msk [vmem:[#allocation7 + $0x14] sm:$0xf] %vm266_vm4, %v119_v51 }
  0x1f   :  { %132 = vst.msk [vmem:[#allocation7 + $0x18] sm:$0xf] %vm266_vm4, %v120_v54  ;;  %v121_v56 = vmul.f32 %v105_v55, %v49_v52 }
  0x21   :  { %133 = vst.msk [vmem:[#allocation7 + $0x1c] sm:$0xf] %vm266_vm4, %v121_v56 }
  0x22   :  { %137 = vsyncadd [#allocation4], 448  ;;  %s140_s21 = sshll.u32 %s318_s2, 4  ;;  %s241_s22 = smov [#allocation7]   ;;  %s141_s21 = int_to_ptr.hbm [resolvable:$true] %s140_s21 }
  0x23   :  { %s138_s23 = sshll.u32 %s241_s22, 4  ;;  %s139_s23 = int_to_ptr.vmem [resolvable:$true] %s138_s23 }
  0x24   :  { %146 = dma.vmem_to_hbm [thread:$0]  %s139_s23, 64, %s141_s21, [#allocation4], %s238_s17, %s238_s17, %s239_s18  }
  0x25   :  { %235 = dma.done.wait [#allocation4], 512  }
  0x26   :  { %236 = vsyncadd [#allocation4], 4294966784 }
  0x27   :  { %151 = vsyncpa [#allocation3], 1 }
  0x28   :  { %152 = vsyncpa [#allocation6], 1 }
  0x29   :  { %153 = vsyncpa [#allocation4], 1 }

</bundles_post_ra>
